<compile_context>
chip_gen: v7x
topology: tpu7x:2x2x1
jax: 0.10.0
libtpu: 0.0.40
codegen_flags: <defaults>
</compile_context>

<pallas_src>
import functools

import jax
import jax.numpy as jnp
from jax.experimental import pallas as pl
from jax.experimental.pallas import tpu as pltpu


def _kd_kernel(s_ref, t_ref, out_ref, acc_ref, *, inv_tau: float):
    """Grid = (P cores-parallel, steps-arbitrary). One step = (TR, L) row block.

    acc_ref : (TR, 1) f32 VMEM scratch, per-row partial KD sums (per core).
    out_ref : (8, 128) f32 block per core; filled with the core total at the
              last step (lane-dense, unmasked store).
    """
    j = pl.program_id(1)

    @pl.when(j == 0)
    def _():
        acc_ref[...] = jnp.zeros_like(acc_ref)

    s = s_ref[...].astype(jnp.float32)
    t = t_ref[...].astype(jnp.float32)
    if inv_tau != 1.0:
        s = s * inv_tau
        t = t * inv_tau

    # Numerically stable shifted logits.
    t_max = jnp.max(t, axis=-1, keepdims=True)
    s_max = jnp.max(s, axis=-1, keepdims=True)
    t_shift = t - t_max
    s_shift = s - s_max

    et = jnp.exp(t_shift)
    es = jnp.exp(s_shift)
    z_t = jnp.sum(et, axis=-1, keepdims=True)
    z_s = jnp.sum(es, axis=-1, keepdims=True)

    # Factored KL(p_T || p_S):
    #   sum_j p_j * (log p_j - log q_j)
    #     = (1/Z_t) * sum_j e_t_j * (t_shift_j - s_shift_j) + log(Z_s / Z_t)
    # Only the lane (L) axis is reduced per step; the log / reciprocal are on
    # (TR, 1) columns.  Zero-padded rows contribute exactly 0.
    num = jnp.sum(et * (t_shift - s_shift), axis=-1, keepdims=True)
    acc_ref[...] += num * (1.0 / z_t) + jnp.log(z_s * (1.0 / z_t))

    @pl.when(j == pl.num_programs(1) - 1)
    def _():
        out_ref[...] = jnp.full_like(out_ref, jnp.sum(acc_ref[...]))


def unidistill_loss(preds_S,
                    preds_T,
                    tau: float = 1.0,
                    loss_weight: float = 1.0,
                    block_rows=None) -> jax.Array:
    """JAX/Pallas equivalent of UniDistillLoss.forward for (N, C, H, W) inputs."""
    if isinstance(preds_S, (list, tuple)):
        preds_S = preds_S[-1]
        preds_T = preds_T[-1]

    # Glue: match-teacher-resolution branch (bilinear, align_corners=False).
    if preds_S.shape[-2:] != preds_T.shape[-2:]:
        N_, C_ = preds_S.shape[:2]
        H_new, W_new = preds_T.shape[-2:]
        preds_S = jax.image.resize(preds_S, (N_, C_, H_new, W_new), method="linear")

    N, C, H, W = preds_S.shape
    R = N * C
    L = H * W

    # Native dtype straight into the kernel (no wrapper-side f32 upcast).
    s2d = preds_S.reshape(R, L)
    t2d = preds_T.reshape(R, L)
    elem_bytes = max(s2d.dtype.itemsize, t2d.dtype.itemsize)

    # ---- tile selection ------------------------------------------------
    # Keep one f32 intermediate tile <= ~2 MiB so the handful of live
    # intermediates plus the 2x double-buffered input blocks fit comfortably
    # in VMEM on every generation (v7x has only 64 MiB physical VMEM).
    F32_TILE_BUDGET = 2 * 1024 * 1024
    max_tr = max(8, (F32_TILE_BUDGET // (L * 4)) // 8 * 8)
    if block_rows is not None:
        max_tr = max(8, (int(block_rows) // 8) * 8)

    r_ceil8 = ((R + 7) // 8) * 8
    TR = min(max_tr, r_ceil8)

    steps = -(-r_ceil8 // TR)                 # cdiv
    P = 2 if steps >= 2 else 1                # split rows across TCs (v7x megacore)
    steps_per_core = -(-steps // P)
    R_pad = P * steps_per_core * TR

    if R_pad != R:
        # Zero rows contribute exactly 0 (teacher == student => KL term is 0).
        pad = R_pad - R
        s2d = jnp.pad(s2d, ((0, pad), (0, 0)))
        t2d = jnp.pad(t2d, ((0, pad), (0, 0)))

    kernel = functools.partial(_kd_kernel, inv_tau=float(1.0 / float(tau)))

    cost = pl.CostEstimate(
        flops=8 * R_pad * L,
        transcendentals=2 * R_pad * L,
        bytes_accessed=2 * R_pad * L * elem_bytes + P * 8 * 128 * 4,
    )

    raw = pl.pallas_call(
        kernel,
        out_shape=jax.ShapeDtypeStruct((P * 8, 128), jnp.float32),
        grid_spec=pltpu.PrefetchScalarGridSpec(
            num_scalar_prefetch=0,
            grid=(P, steps_per_core),
            in_specs=[
                pl.BlockSpec((TR, L), lambda p, j: (p * steps_per_core + j, 0)),
                pl.BlockSpec((TR, L), lambda p, j: (p * steps_per_core + j, 0)),
            ],
            out_specs=pl.BlockSpec((8, 128), lambda p, j: (p, 0)),
            scratch_shapes=[pltpu.VMEM((TR, 1), jnp.float32)],
        ),
        compiler_params=pltpu.CompilerParams(
            dimension_semantics=("parallel", "arbitrary"),
            vmem_limit_bytes=48 * 1024 * 1024,
        ),
        cost_estimate=cost,
    )(s2d, t2d)

    per_core = raw.reshape(P, 8, 128)[:, 0, 0]
    loss = jnp.sum(per_core) * (float(tau) ** 2)
    loss = float(loss_weight) * loss / (C * N)
    return loss


def _reference_loss(preds_S, preds_T, tau=1.0, loss_weight=1.0):
    """Pure-JAX reference mirroring the PyTorch code, for a sanity check."""
    N, C, H, W = preds_S.shape
    s = preds_S.astype(jnp.float32).reshape(-1, W * H) / tau
    t = preds_T.astype(jnp.float32).reshape(-1, W * H) / tau
    sm_t = jax.nn.softmax(t, axis=1)
    loss = jnp.sum(sm_t * jax.nn.log_softmax(t, axis=1)
                   - sm_t * jax.nn.log_softmax(s, axis=1)) * tau ** 2
    return loss_weight * loss / (C * N)


def _check(out, ref, name):
    out = jax.block_until_ready(out)
    assert jnp.allclose(out, ref, rtol=1e-4, atol=1e-5), (name, out, ref)


if __name__ == "__main__":
    key = jax.random.PRNGKey(0)
    k1, k2, k3, k4, k5, k6 = jax.random.split(key, 6)

    # Case 1: baseline small shape, tau=1.
    N, C, H, W = 2, 4, 16, 16
    sS = jax.random.normal(k1, (N, C, H, W), dtype=jnp.float32)
    sT = jax.random.normal(k2, (N, C, H, W), dtype=jnp.float32)
    out = unidistill_loss(sS, sT, tau=1.0, loss_weight=1.0)
    _check(out, _reference_loss(sS, sT, 1.0, 1.0), "case1")

    # Case 2: N*C not a multiple of 8 (exercises zero-row padding), tau=2.
    N, C, H, W = 3, 5, 8, 16
    pS = jax.random.normal(k3, (N, C, H, W), dtype=jnp.float32)
    pT = jax.random.normal(k4, (N, C, H, W), dtype=jnp.float32)
    out = unidistill_loss(pS, pT, tau=2.0, loss_weight=0.5)
    _check(out, _reference_loss(pS, pT, 2.0, 0.5), "case2")

    # Case 3: multi-step grid + 2-way core-parallel split (small forced tile).
    N, C, H, W = 4, 16, 8, 16
    mS = jax.random.normal(k5, (N, C, H, W), dtype=jnp.float32)
    mT = jax.random.normal(k6, (N, C, H, W), dtype=jnp.float32)
    out = unidistill_loss(mS, mT, tau=1.0, loss_weight=1.0, block_rows=8)
    _check(out, _reference_loss(mS, mT, 1.0, 1.0), "case3")

    # Case 4: bf16 inputs go through the kernel natively (no wrapper upcast).
    bS = sS.astype(jnp.bfloat16)
    bT = sT.astype(jnp.bfloat16)
    out = unidistill_loss(bS, bT, tau=1.0, loss_weight=1.0)
    _check(out, _reference_loss(bS, bT, 1.0, 1.0), "case4")

    # TODO(synk): FeatureDistillLoss / BEVDistillLoss / ResponseDistillLoss are
    # auxiliary static methods (grid_sample, gaussian box masks, reduce_mean)
    # not exercised by forward(); they are not implemented here.

    print("KERNEL_OK")
</pallas_src>

<mosaic_0001>
module attributes {stable_mosaic.version = 11 : i64} {
  func.func @_kd_kernel(%arg0: i32, %arg1: i32, %arg2: memref<8x256xf32, #tpu.memory_space<vmem>>, %arg3: memref<8x256xf32, #tpu.memory_space<vmem>>, %arg4: memref<8x128xf32, #tpu.memory_space<vmem>>, %arg5: memref<8x1xf32, #tpu.memory_space<vmem>>) attributes {dimension_semantics = [#tpu.dimension_semantics<parallel>, #tpu.dimension_semantics<arbitrary>], iteration_bounds = array<i64: 1, 1>, scalar_prefetch = 0 : i64, scratch_operands = 1 : i64, tpu.core_type = #tpu.core_type<tc>, window_params = [{transform_indices = @transform_0, window_bounds = array<i64: 8, 256>}, {transform_indices = @transform_1, window_bounds = array<i64: 8, 256>}, {transform_indices = @transform_2, window_bounds = array<i64: 8, 128>}]} {
    %c0_i32 = arith.constant 0 : i32
    %0 = arith.cmpi eq, %arg1, %c0_i32 : i32
    %1 = arith.extui %0 : i1 to i32
    %c0_i32_0 = arith.constant 0 : i32
    %2 = arith.cmpi ne, %1, %c0_i32_0 : i32
    scf.if %2 {
      %cst_16 = arith.constant 0.000000e+00 : f32
      %37 = vector.broadcast %cst_16 : f32 to vector<8x1xf32>
      %c0_17 = arith.constant 0 : index
      %c0_18 = arith.constant 0 : index
      %38 = vector.load %arg5[%c0_17, %c0_18] : memref<8x1xf32, #tpu.memory_space<vmem>>, vector<8x1xf32>
      tpu.vector_store %arg5[%c0_17, %c0_18], %37 {strides = array<i32>} : memref<8x1xf32, #tpu.memory_space<vmem>>, vector<8x1xf32>,
    } else {
    }
    %c0 = arith.constant 0 : index
    %c0_1 = arith.constant 0 : index
    %3 = vector.load %arg2[%c0, %c0_1] : memref<8x256xf32, #tpu.memory_space<vmem>>, vector<8x256xf32>
    %c0_2 = arith.constant 0 : index
    %c0_3 = arith.constant 0 : index
    %4 = vector.load %arg3[%c0_2, %c0_3] : memref<8x256xf32, #tpu.memory_space<vmem>>, vector<8x256xf32>
    %cst = arith.constant dense<0xFF800000> : vector<8xf32>
    %5 = vector.multi_reduction <maximumf>, %4, %cst [1] : vector<8x256xf32> to vector<8xf32>
    %6 = vector.shape_cast %5 : vector<8xf32> to vector<8x1xf32>
    %cst_4 = arith.constant dense<0xFF800000> : vector<8xf32>
    %7 = vector.multi_reduction <maximumf>, %3, %cst_4 [1] : vector<8x256xf32> to vector<8xf32>
    %8 = vector.shape_cast %7 : vector<8xf32> to vector<8x1xf32>
    %9 = vector.broadcast %6 : vector<8x1xf32> to vector<8x256xf32>
    %10 = arith.subf %4, %9 : vector<8x256xf32>
    %11 = vector.broadcast %8 : vector<8x1xf32> to vector<8x256xf32>
    %12 = arith.subf %3, %11 : vector<8x256xf32>
    %13 = math.exp %10 : vector<8x256xf32>
    %14 = math.exp %12 : vector<8x256xf32>
    %cst_5 = arith.constant dense<0.000000e+00> : vector<8xf32>
    %15 = vector.multi_reduction <add>, %13, %cst_5 [1] : vector<8x256xf32> to vector<8xf32>
    %16 = vector.shape_cast %15 : vector<8xf32> to vector<8x1xf32>
    %cst_6 = arith.constant dense<0.000000e+00> : vector<8xf32>
    %17 = vector.multi_reduction <add>, %14, %cst_6 [1] : vector<8x256xf32> to vector<8xf32>
    %18 = vector.shape_cast %17 : vector<8xf32> to vector<8x1xf32>
    %19 = arith.subf %10, %12 : vector<8x256xf32>
    %20 = arith.mulf %13, %19 : vector<8x256xf32>
    %cst_7 = arith.constant dense<0.000000e+00> : vector<8xf32>
    %21 = vector.multi_reduction <add>, %20, %cst_7 [1] : vector<8x256xf32> to vector<8xf32>
    %22 = vector.shape_cast %21 : vector<8xf32> to vector<8x1xf32>
    %c0_8 = arith.constant 0 : index
    %c0_9 = arith.constant 0 : index
    %23 = vector.load %arg5[%c0_8, %c0_9] : memref<8x1xf32, #tpu.memory_space<vmem>>, vector<8x1xf32>
    %cst_10 = arith.constant 1.000000e+00 : f32
    %24 = vector.broadcast %cst_10 : f32 to vector<8x1xf32>
    %25 = arith.divf %24, %16 : vector<8x1xf32>
    %26 = arith.mulf %22, %25 : vector<8x1xf32>
    %cst_11 = arith.constant 1.000000e+00 : f32
    %27 = vector.broadcast %cst_11 : f32 to vector<8x1xf32>
    %28 = arith.divf %27, %16 : vector<8x1xf32>
    %29 = arith.mulf %18, %28 : vector<8x1xf32>
    %30 = math.log %29 : vector<8x1xf32>
    %31 = arith.addf %26, %30 : vector<8x1xf32>
    %32 = arith.addf %23, %31 : vector<8x1xf32>
    %c0_12 = arith.constant 0 : index
    %c0_13 = arith.constant 0 : index
    %33 = vector.load %arg5[%c0_12, %c0_13] : memref<8x1xf32, #tpu.memory_space<vmem>>, vector<8x1xf32>
    tpu.vector_store %arg5[%c0_12, %c0_13], %32 {strides = array<i32>} : memref<8x1xf32, #tpu.memory_space<vmem>>, vector<8x1xf32>,
    %c0_i32_14 = arith.constant 0 : i32
    %34 = arith.cmpi eq, %arg1, %c0_i32_14 : i32
    %35 = arith.extui %34 : i1 to i32
    %c0_i32_15 = arith.constant 0 : i32
    %36 = arith.cmpi ne, %35, %c0_i32_15 : i32
    scf.if %36 {
      %c0_16 = arith.constant 0 : index
      %c0_17 = arith.constant 0 : index
      %37 = vector.load %arg5[%c0_16, %c0_17] : memref<8x1xf32, #tpu.memory_space<vmem>>, vector<8x1xf32>
      %38 = vector.shape_cast %37 : vector<8x1xf32> to vector<1x8x1xf32>
      %cst_18 = arith.constant dense<0.000000e+00> : vector<1xf32>
      %39 = vector.multi_reduction <add>, %38, %cst_18 [1, 2] : vector<1x8x1xf32> to vector<1xf32>
      %40 = vector.shape_cast %39 : vector<1xf32> to vector<1x1x1xf32>
      %41 = vector.extract %40[0, 0, 0] : f32 from vector<1x1x1xf32>
      %42 = vector.broadcast %41 : f32 to vector<8x128xf32>
      %c0_19 = arith.constant 0 : index
      %c0_20 = arith.constant 0 : index
      %43 = vector.load %arg4[%c0_19, %c0_20] : memref<8x128xf32, #tpu.memory_space<vmem>>, vector<8x128xf32>
      tpu.vector_store %arg4[%c0_19, %c0_20], %42 {strides = array<i32>} : memref<8x128xf32, #tpu.memory_space<vmem>>, vector<8x128xf32>,
    } else {
    }
    return
  }
  func.func @transform_0(%arg0: i32, %arg1: i32) -> (i32, i32) {
    %c1_i32 = arith.constant 1 : i32
    %0 = arith.muli %arg0, %c1_i32 : i32
    %1 = arith.addi %0, %arg1 : i32
    %c0_i32 = arith.constant 0 : i32
    %c0_i32_0 = arith.constant 0 : i32
    return %1, %c0_i32 : i32, i32
  }
  func.func @transform_1(%arg0: i32, %arg1: i32) -> (i32, i32) {
    %c1_i32 = arith.constant 1 : i32
    %0 = arith.muli %arg0, %c1_i32 : i32
    %1 = arith.addi %0, %arg1 : i32
    %c0_i32 = arith.constant 0 : i32
    %c0_i32_0 = arith.constant 0 : i32
    return %1, %c0_i32 : i32, i32
  }
  func.func @transform_2(%arg0: i32, %arg1: i32) -> (i32, i32) {
    %c0_i32 = arith.constant 0 : i32
    %c0_i32_0 = arith.constant 0 : i32
    return %arg0, %c0_i32 : i32, i32
  }
}

</mosaic_0001>

<bundles_post_ra>
// kernel: tpu_custom_call.1
= control target key start
LH: loop header
LB: loop body
LE: loop exit
PB: predicated region body
PF: predicated region fallthrough
CT: control target
= control target key end

     0   :  { %7 = vsyncpa [#allocation4], 0  ;;  %s278_s0 = inlined_call_operand.hbm [shape: f32[8,256], index: 0, kind: input, shape index: {}]   ;;  %s279_s1 = inlined_call_operand.hbm [shape: f32[8,256], index: 1, kind: input, shape index: {}]   ;;  %s280_s2 = inlined_call_operand.hbm [shape: f32[8,128], index: 2, kind: output, shape index: {}]  }
   0x1   :  { %8 = vsyncpa [#allocation7], 0 }
   0x2   :  { %9 = vsyncpa [#allocation5], 0  ;;  %s220_s9 = smov [#allocation3]   ;;  %s221_s11 = smov [#allocation6]  }
   0x3   :  { %s20_s10 = sshll.u32 %s220_s9, 4  ;;  %s34_s12 = sshll.u32 %s221_s11, 4  ;;  %s21_s10 = int_to_ptr.vmem [resolvable:$true] %s20_s10  ;;  %s35_s12 = int_to_ptr.vmem [resolvable:$true] %s34_s12 }
   0x4   :  { %s148_s15 = scalar_lea.hbm %s278_s0, 256 }
   0x5   :  { %p149_p0 = scmp.ne.s32.totalorder %s278_s0, %s148_s15  ;;  %p152_p1 = scmp.lt.u32.totalorder %s148_s15, %s278_s0 }
   0x7   :  { %p154_p2 = pnand %p152_p1, %p149_p0 }
   0x9   :  { %157 = shalt.err (!%p154_p2)
}
   0xa   :  { %s158_s20 = scalar_lea.vmem %s21_s10, 256  ;;  %p163_p4 = scmp.lt.s32.totalorder %s21_s10, %s21_s10 }
   0xb   :  { %p159_p3 = scmp.ne.s32.totalorder %s21_s10, %s158_s20  ;;  %p164_p5 = scmp.lt.s32.totalorder %s158_s20, %s158_s20 }
   0xd   :  { %p165_p6 = por %p164_p5, %p163_p4 }
   0xf   :  { %p166_p7 = pnand %p165_p6, %p159_p3 }
  0x11   :  { %169 = shalt.err (!%p166_p7)
}
  0x12   :  { %23 = dma.hbm_to_vmem [thread:$0]  %s278_s0, 256, %s21_s10, [#allocation4]  }
  0x13   :  { %s170_s25 = scalar_lea.hbm %s279_s1, 256 }
  0x14   :  { %p171_p8 = scmp.ne.s32.totalorder %s279_s1, %s170_s25  ;;  %p174_p9 = scmp.lt.u32.totalorder %s170_s25, %s279_s1 }
  0x16   :  { %p176_p10 = pnand %p174_p9, %p171_p8 }
  0x18   :  { %179 = shalt.err (!%p176_p10)
}
  0x19   :  { %s180_s30 = scalar_lea.vmem %s35_s12, 256  ;;  %p185_p12 = scmp.lt.s32.totalorder %s35_s12, %s35_s12 }
  0x1a   :  { %p181_p11 = scmp.ne.s32.totalorder %s35_s12, %s180_s30  ;;  %p186_p13 = scmp.lt.s32.totalorder %s180_s30, %s180_s30 }
  0x1c   :  { %p187_p0 = por %p186_p13, %p185_p12 }
  0x1e   :  { %p188_p1 = pnand %p187_p0, %p181_p11 }
  0x20   :  { %191 = shalt.err (!%p188_p1)
}
  0x21   :  { %37 = dma.hbm_to_vmem [thread:$0]  %s279_s1, 256, %s35_s12, [#allocation7]  }
  0x22   :  { %214 = dma.done.wait [#allocation4], 256  }
  0x23   :  { %215 = vsyncadd [#allocation4], 4294967040 }
  0x24   :  { %216 = dma.done.wait [#allocation7], 256  }
  0x25   :  { %217 = vsyncadd [#allocation7], 4294967040  ;;  %v54_v0 = vld [vmem:[#allocation6] sm:$0xff]  ;;  %v55_v1 = vld [vmem:[#allocation6 + $0x8] sm:$0xff]  ;;  %vm50_vm0 = vcmask 7168   ;;  %v222_v27 = vmov 0.0  }
  0x26   :  { %v52_v2 = vld [vmem:[#allocation3] sm:$0xff]  ;;  %v56_v3 = vmax.f32 %v54_v0, %v55_v1  ;;  %v53_v4 = vld [vmem:[#allocation3 + $0x8] sm:$0xff]  ;;  %51 = vst.msk [vmem:[#allocation2] sm:$0xff] %vm50_vm0, %v222_v27  ;;  %s223_s1 = smov [#allocation8]  }
  0x27   :  { %v59_v5 = vmax.f32 %v52_v2, %v53_v4  ;;  %s120_s4 = sshll.u32 %s223_s1, 4  ;;  %s121_s4 = int_to_ptr.vmem [resolvable:$true] %s120_s4 }
  0x28   :  { %57 = vmax.xlane.f32.xlu0 %v56_v3  ;;  %s192_s6 = scalar_lea.vmem %s121_s4, 128  ;;  %p197_p3 = scmp.lt.s32.totalorder %s121_s4, %s121_s4 }
  0x29   :  { %p193_p2 = scmp.ne.s32.totalorder %s121_s4, %s192_s6  ;;  %p198_p4 = scmp.lt.s32.totalorder %s192_s6, %s192_s6 }
  0x2b   :  { %p199_p5 = por %p198_p4, %p197_p3 }
  0x2c   :  { %60 = vmax.xlane.f32.xlu0 %v59_v5 }
  0x2d   :  { %v87_v36 = vld [vmem:[#allocation2] sm:$0xff]  ;;  %p200_p6 = pnand %p199_p5, %p193_p2 }
  0xb5   :  { %v58_v6 = vpop.xlane.xlu0 %57 }
  0xb6   :  { %v62_v7 = vsub.f32 %v54_v0, %v58_v6  ;;  %v63_v8 = vsub.f32 %v55_v1, %v58_v6 }
  0xb8   :  { %v66_v9 = vmul.f32 1.442695, %v62_v7  ;;  %v68_v10 = vmul.f32 1.442695, %v63_v8 }
  0xb9   :  { %v61_v11 = vpop.xlane.xlu0 %60 }
  0xba   :  { %136 = vpow2.f32 %v66_v9  ;;  %v64_v12 = vsub.f32 %v52_v2, %v61_v11  ;;  %v65_v13 = vsub.f32 %v53_v4, %v61_v11 }
  0xbb   :  { %138 = vpow2.f32 %v68_v10 }
  0xbc   :  { %v70_v14 = vmul.f32 1.442695, %v64_v12  ;;  %v72_v15 = vmul.f32 1.442695, %v65_v13  ;;  %v80_v16 = vsub.f32 %v62_v7, %v64_v12  ;;  %v81_v18 = vsub.f32 %v63_v8, %v65_v13 }
  0xbe   :  { %140 = vpow2.f32 %v70_v14 }
  0xbf   :  { %142 = vpow2.f32 %v72_v15 }
  0xc4   :  { %v137_v17 = vpop.eup %136 }
  0xc5   :  { %v139_v19 = vpop.eup %138  ;;  %v82_v20 = vmul.f32 %v137_v17, %v80_v16 }
  0xc6   :  { %v74_v21 = vadd.f32 %v139_v19, %v137_v17  ;;  %v83_v22 = vmul.f32 %v139_v19, %v81_v18 }
  0xc8   :  { %v141_v23 = vpop.eup %140  ;;  %75 = vadd.xlane.f32.xlu1 %v74_v21  ;;  %v84_v24 = vadd.f32 %v83_v22, %v82_v20 }
  0xc9   :  { %v143_v25 = vpop.eup %142 }
  0xca   :  { %85 = vadd.xlane.f32.xlu0 %v84_v24  ;;  %v77_v26 = vadd.f32 %v143_v25, %v141_v23 }
  0xcc   :  { %78 = vadd.xlane.f32.xlu1 %v77_v26 }
 0x155   :  { %v76_v28 = vpop.xlane.xlu1 %75 }
 0x156   :  { %144 = vrcp.f32 %v76_v28 }
 0x157   :  { %v86_v33 = vpop.xlane.xlu0 %85 }
 0x159   :  { %v79_v29 = vpop.xlane.xlu1 %78 }
 0x160   :  { %v145_v30 = vpop.eup %144 }
 0x161   :  { %v91_v31 = vmul.f32 %v145_v30, %v79_v29  ;;  %v90_v34 = vmul.f32 %v145_v30, %v86_v33 }
 0x163   :  { %146 = vlog2.f32 %v91_v31 }
 0x16d   :  { %v147_v32 = vpop.eup %146 }
 0x16e   :  { %v93_v35 = vmul.f32 0.6931472, %v147_v32 }
 0x170   :  { %v94_v37 = vadd.f32 %v93_v35, %v90_v34 }
 0x172   :  { %v95_v38 = vadd.f32 %v94_v37, %v87_v36 }
 0x174   :  { %97 = vst.msk [vmem:[#allocation2] sm:$0xff] %vm50_vm0, %v95_v38 }
 0x17b   :  { %v101_v39 = vld [vmem:[#allocation2] sm:$0xff] }
 0x17c   :  { %v102_v40 = vsel %vm50_vm0, %v101_v39, 0.0 }
 0x17d   :  { %103 = vadd.xlane.f32.xlu1 %v102_v40 }
 0x20a   :  { %v104_v41 = vpop.xlane.xlu1 %103 }
 0x20b   :  { %v105_v42 = vrot.slane %v104_v41, 4 }
 0x20d   :  { %v106_v43 = vadd.f32 %v105_v42, %v104_v41 }
 0x20f   :  { %v107_v44 = vrot.slane %v106_v43, 2 }
 0x211   :  { %v108_v45 = vadd.f32 %v107_v44, %v106_v43 }
 0x213   :  { %v109_v46 = vrot.slane %v108_v45, 1 }
 0x215   :  { %v110_v47 = vadd.f32 %v109_v46, %v108_v45 }
 0x217   :  { %130 = vpush %v110_v47 }
 0x248   :  { %s131_s5 = spop %130 }
 0x249   :  { %v112_v48 = vstv %s131_s5 }
 0x24a   :  { %113 = vst [vmem:[#allocation8] sm:$0xff] %v112_v48 }
 0x24b   :  { %203 = shalt.err (!%p200_p6)
}
 0x24c   :  { %s204_s9 = scalar_lea.hbm %s280_s2, 128 }
 0x24d   :  { %p205_p7 = scmp.ne.s32.totalorder %s280_s2, %s204_s9  ;;  %p208_p8 = scmp.lt.u32.totalorder %s204_s9, %s280_s2 }
 0x24f   :  { %p210_p9 = pnand %p208_p8, %p205_p7 }
 0x251   :  { %213 = shalt.err (!%p210_p9)
}
 0x252   :  { %123 = dma.vmem_to_hbm [thread:$0]  %s121_s4, 128, %s280_s2, [#allocation5]  }
 0x253   :  { %218 = dma.done.wait [#allocation5], 128  }
 0x254   :  { %219 = vsyncadd [#allocation5], 4294967168 }
 0x255   :  { %127 = vsyncpa [#allocation4], 1 }
 0x256   :  { %128 = vsyncpa [#allocation7], 1 }
 0x257   :  { %129 = vsyncpa [#allocation5], 1 }

</bundles_post_ra>
